<compile_context>
chip_gen: v7x
topology: tpu7x:2x2x1
jax: 0.10.0
libtpu: 0.0.40
codegen_flags: <defaults>
</compile_context>

<pallas_src>
import functools
import numpy as np
import jax
import jax.numpy as jnp
from jax.experimental import pallas as pl
from jax.experimental.pallas import tpu as pltpu

SLAB_W = 128  # lane-dense fused-matmul output width


def _align8(x):
    return ((x + 7) // 8) * 8


# ---------------------------------------------------------------------------
# fused Pallas kernel: one MXU pass, one unmasked lane-dense store
# ---------------------------------------------------------------------------
def _fused_matmul_kernel(lhs_ref, rhs_ref, out_ref):
    out_ref[...] = jnp.dot(lhs_ref[...], rhs_ref[...],
                           preferred_element_type=jnp.float32)


@functools.lru_cache(maxsize=None)
def _build_fused_call(Vn, Kn, Vm, Km, D):
    """Build (once per shape signature) the jitted pack+pallas_call pipeline."""
    rows = Vn + Kn + Km
    rows_pad = _align8(rows)
    rhs_rows = Vn + Kn + Vm + Km
    assert rhs_rows <= SLAB_W and Kn >= 5

    call = pl.pallas_call(
        _fused_matmul_kernel,
        out_shape=jax.ShapeDtypeStruct((rows_pad, SLAB_W), jnp.float32),
        in_specs=[pl.BlockSpec(memory_space=pltpu.MemorySpace.VMEM),
                  pl.BlockSpec(memory_space=pltpu.MemorySpace.VMEM)],
        out_specs=pl.BlockSpec(memory_space=pltpu.MemorySpace.VMEM),
    )

    @jax.jit
    def run(Vuser, Kuser, Vitem, Kitem):
        f32 = lambda a: a.astype(jnp.float32)
        lhs = jnp.concatenate([f32(Vuser), f32(Kuser), f32(Kitem)], axis=0)
        lhs = jnp.pad(lhs, ((0, rows_pad - rows), (0, 0)))
        rhs = jnp.concatenate(
            [f32(Vuser), f32(Kuser), f32(Vitem), f32(Kitem)], axis=0)
        rhs = jnp.pad(rhs, ((0, SLAB_W - rhs_rows), (0, 0))).T  # (D, 128)
        return call(lhs, rhs)

    return run


def _slab_slices(slab, Vn, Kn, Vm, Km):
    """Slice the five pairwise products out of the fused (rows_pad, 128) slab."""
    r_v, r_k, r_i = 0, Vn, Vn + Kn            # LHS row offsets
    c_v, c_k = 0, Vn                          # RHS lane offsets
    c_vi, c_ki = Vn + Kn, Vn + Kn + Vm
    vu_adj = slab[r_v:r_v + Vn, c_v:c_v + Vn]
    ku_adj = slab[r_k:r_k + Kn, c_k:c_k + Kn]
    vi_adj = slab[r_v:r_v + Vn, c_vi:c_vi + Vm]
    ki_adj = slab[r_k:r_k + 5, c_ki:c_ki + Km]
    ii_adj = slab[r_i:r_i + Km, c_vi:c_vi + Vm]
    return vu_adj, ku_adj, vi_adj, ki_adj, ii_adj


# ---------------------------------------------------------------------------
# contrast_loss: faithful host-side re-implementation of the torch reference
# ---------------------------------------------------------------------------
def contrast_loss_host(padj, nadj, px, nx, rng):
    padj = np.asarray(padj, dtype=np.float32)
    nadj = np.asarray(nadj, dtype=np.float32)
    px = np.asarray(px, dtype=np.float32)
    nx = np.asarray(nx, dtype=np.float32)

    pcnt = (padj > 0).sum(axis=1).astype(np.int32)
    ncnt = (nadj > 0).sum(axis=1).astype(np.int32)
    pinc = np.argsort(padj, axis=1, kind="stable")   # ascending, like torch.sort
    ninc = np.argsort(nadj, axis=1, kind="stable")
    pval = np.take_along_axis(padj, pinc, axis=1)
    nval = np.take_along_axis(nadj, ninc, axis=1)

    loss = 0.0
    for i in range(pcnt.shape[0]):
        num = int(min(pcnt[i], ncnt[i]))
        if num <= 0:
            continue
        if num == pcnt[i]:
            w = nval[i, -int(ncnt[i]):]
            idx = rng.choice(int(ncnt[i]), size=num, replace=True, p=w / w.sum())
            idx = idx - int(ncnt[i])                 # negative indices from the end
            neg_cols = ninc[i, idx]
            pos_cols = pinc[i, -num:]
        else:
            w = pval[i, -int(pcnt[i]):]
            idx = rng.choice(int(pcnt[i]), size=num, replace=True, p=w / w.sum())
            idx = idx - int(pcnt[i])
            pos_cols = pinc[i, idx]
            neg_cols = ninc[i, -num:]
        term = np.clip(nx[i, neg_cols] - px[i, pos_cols] + 1.0, 0.0, None).mean()
        loss += float(term)
    return loss


# ---------------------------------------------------------------------------
# forward pass (matches Pretrain_loss_test.forward)
# ---------------------------------------------------------------------------
def pretrain_loss_forward(KUU_adj, VUU_adj, Vuser, Vitem, Kuser, Kitem,
                          Vid, preference, Vpreference, structure, seed=0):
    del Vpreference  # unused by the reference forward
    rng = np.random.default_rng(seed)

    Vn = Vuser.shape[0]
    Kn = Kuser.shape[0]
    Vm = Vitem.shape[0]
    Km = Kitem.shape[0]
    D = Vuser.shape[1]

    # ---- 1) launch the fused device kernel first (async dispatch) ----
    run = _build_fused_call(Vn, Kn, Vm, Km, D)
    slab_dev = run(Vuser, Kuser, Vitem, Kitem)

    # ---- 2) host-side preprocessing, overlapping with device execution ----
    VUU, KUU, pref, Vid_np, struct_np = jax.device_get(
        (VUU_adj, KUU_adj, preference, Vid, structure))
    VUU = np.asarray(VUU, np.float32)
    KUU = np.asarray(KUU, np.float32)
    pref = np.asarray(pref, np.float32)
    Vid_np = np.asarray(Vid_np)
    struct_np = np.asarray(struct_np, np.float32)
    assert struct_np.shape[1] >= Vm

    e1 = np.eye(VUU.shape[0], dtype=np.float32)
    tmp1 = -(VUU - 1.0) - e1

    e2 = np.eye(KUU.shape[0], dtype=np.float32)
    tmp2 = (-(KUU - 1.0) - e2)[:Vn, -3:]

    VUI_adj = pref[Vid_np[5:], :].T
    tmp3 = -(VUI_adj - 1.0)        # (the >0 -> 1 step is overwritten in torch)
    KUI_adj = pref.T
    tmp4 = -(KUI_adj - 1.0)

    # ---- 3) single device->host transfer of the fused matmul slab ----
    slab = np.asarray(jax.device_get(slab_dev))
    Vu_adj, Ku_adj, Vi_adj, Ki_adj, ii_adj = _slab_slices(slab, Vn, Kn, Vm, Km)

    # ii / argmax / argmin on host (nanoseconds at these sizes)
    ii = float(np.abs(ii_adj - struct_np[:, :Vm]).mean())
    Recommend_i = np.argmax(Vi_adj, axis=1).astype(np.int64)
    Replace_i = np.argmin(Vi_adj, axis=1).astype(np.int64)
    Substitute_i = np.argmax(Ki_adj, axis=1).astype(np.int64)

    # ---- 4) contrast losses (host, data-dependent stochastic loops) ----
    Vu = contrast_loss_host(VUU, tmp1, Vu_adj, Vu_adj, rng)
    Ku = contrast_loss_host(KUU[:Vn, :KUU.shape[1] - 3], tmp2,
                            Ku_adj[:Vn, :Ku_adj.shape[1] - 3],
                            Ku_adj[:Vn, -3:], rng)
    Vi = contrast_loss_host(VUI_adj, tmp3, Vi_adj, Vi_adj, rng)
    Ki = contrast_loss_host(KUI_adj, tmp4, Ki_adj, Ki_adj, rng)

    # ---- 5) Recommend / Replace / Substitute (data-dependent break -> host) ----
    Recommend = 0.0
    Replace = 0.0
    Substitute = 0.0
    for i in range(5):
        if Vid_np[i] == -1:
            break
        Recommend += float(pref[Vid_np[Recommend_i[i] + 5], i])
        Replace += float(pref[Vid_np[Replace_i[i] + 5], i])
        Substitute += float(pref[Substitute_i[i], i])

    return Vu, Ku, Vi, Ki, ii, Recommend, Replace, Substitute


# ---------------------------------------------------------------------------
# main
# ---------------------------------------------------------------------------
if __name__ == "__main__":
    key = jax.random.PRNGKey(0)
    ks = jax.random.split(key, 10)

    D = 32          # hidden dim
    Vn = 8          # V users
    Kn = 11         # K users (Kn - 3 = Vn)
    Vm = 6          # V items (len(Vid) = Vm + 5)
    Km = 12         # K items
    P = 12          # preference rows (= Km so KUI column indices stay valid)
    C = 5           # preference columns

    Vuser = jax.random.normal(ks[0], (Vn, D), jnp.float32) * 0.1
    Kuser = jax.random.normal(ks[1], (Kn, D), jnp.float32) * 0.1
    Vitem = jax.random.normal(ks[2], (Vm, D), jnp.float32) * 0.1
    Kitem = jax.random.normal(ks[3], (Km, D), jnp.float32) * 0.1
    VUU_adj = (jax.random.uniform(ks[4], (Vn, Vn)) > 0.5).astype(jnp.float32)
    KUU_adj = (jax.random.uniform(ks[5], (Kn, Kn)) > 0.5).astype(jnp.float32)
    preference = jax.random.uniform(ks[6], (P, C), dtype=jnp.float32)
    preference = preference * (jax.random.uniform(ks[7], (P, C)) > 0.3).astype(jnp.float32)
    structure = jax.random.normal(ks[8], (Km, 8), jnp.float32) * 0.1
    Vid = jax.random.randint(ks[9], (Vm + 5,), 0, P, dtype=jnp.int32)
    Vpreference = preference  # unused by forward (kept for signature parity)

    # run the fused Pallas kernel once and block on its result
    run_fused = _build_fused_call(Vn, Kn, Vm, Km, D)
    slab_dev = run_fused(Vuser, Kuser, Vitem, Kitem)
    jax.block_until_ready(slab_dev)

    # sanity-check the fused single-matmul layout against individual products
    slab_np = np.asarray(jax.device_get(slab_dev))
    vu, ku, vi, ki, ii = _slab_slices(slab_np, Vn, Kn, Vm, Km)
    Vu_np, Ku_np = np.asarray(Vuser), np.asarray(Kuser)
    Vi_np, Ki_np = np.asarray(Vitem), np.asarray(Kitem)
    np.testing.assert_allclose(vu, Vu_np @ Vu_np.T, rtol=1e-5, atol=1e-5)
    np.testing.assert_allclose(ku, Ku_np @ Ku_np.T, rtol=1e-5, atol=1e-5)
    np.testing.assert_allclose(vi, Vu_np @ Vi_np.T, rtol=1e-5, atol=1e-5)
    np.testing.assert_allclose(ki, Ku_np[:5] @ Ki_np.T, rtol=1e-5, atol=1e-5)
    np.testing.assert_allclose(ii, Ki_np @ Vi_np.T, rtol=1e-5, atol=1e-5)

    # full forward pass (kernel launch overlaps the host contrast-loss prep)
    out = pretrain_loss_forward(KUU_adj, VUU_adj, Vuser, Vitem, Kuser, Kitem,
                                Vid, preference, Vpreference, structure, seed=0)
    vals = [float(v) for v in out]
    assert all(np.isfinite(v) for v in vals)

    print("KERNEL_OK")
</pallas_src>

<mosaic_0001>
module attributes {stable_mosaic.version = 11 : i64} {
  func.func @_fused_matmul_kernel(%arg0: memref<32x32xf32, #tpu.memory_space<vmem>>, %arg1: memref<32x128xf32, #tpu.memory_space<vmem>>, %arg2: memref<32x128xf32, #tpu.memory_space<vmem>>) attributes {dimension_semantics = [], scalar_prefetch = 0 : i64, scratch_operands = 0 : i64, tpu.core_type = #tpu.core_type<tc>} {
    %c0 = arith.constant 0 : index
    %c0_0 = arith.constant 0 : index
    %0 = vector.load %arg0[%c0, %c0_0] : memref<32x32xf32, #tpu.memory_space<vmem>>, vector<32x32xf32>
    %c0_1 = arith.constant 0 : index
    %c0_2 = arith.constant 0 : index
    %1 = vector.load %arg1[%c0_1, %c0_2] : memref<32x128xf32, #tpu.memory_space<vmem>>, vector<32x128xf32>
    %cst = arith.constant dense<0.000000e+00> : vector<32x128xf32>
    %2 = tpu.matmul %0, %1, %cst {dimension_numbers = #tpu.dot_dimension_numbers<[1], [0], [0], [1], [0, 0, 1, 1], [], []>} : vector<32x32xf32>, vector<32x128xf32>, vector<32x128xf32> -> vector<32x128xf32>
    %c0_3 = arith.constant 0 : index
    %c0_4 = arith.constant 0 : index
    %3 = vector.load %arg2[%c0_3, %c0_4] : memref<32x128xf32, #tpu.memory_space<vmem>>, vector<32x128xf32>
    tpu.vector_store %arg2[%c0_3, %c0_4], %2 {strides = array<i32>} : memref<32x128xf32, #tpu.memory_space<vmem>>, vector<32x128xf32>,
    return
  }
}

</mosaic_0001>

<bundles_post_ra>
// kernel: run.1
= control target key start
LH: loop header
LB: loop body
LE: loop exit
PB: predicated region body
PF: predicated region fallthrough
CT: control target
= control target key end

     0   :  { %vm20_vm0 = vcmask 261120   ;;  %s261_s0 = inlined_call_operand.vmem [shape: f32[32,32], index: 0, kind: input, shape index: {}]   ;;  %s262_s1 = inlined_call_operand.vmem [shape: f32[32,128], index: 1, kind: input, shape index: {}]   ;;  %s263_s2 = inlined_call_operand.hbm [shape: f32[32,128], index: 2, kind: output, shape index: {}]  }
   0x1   :  { %v16_v0 = vld [vmem:[%s262_s1] sm:$0xff]  ;;  %v17_v1 = vld [vmem:[%s262_s1 + $0x8] sm:$0xff]  ;;  %v18_v2 = vld [vmem:[%s262_s1 + $0x10] sm:$0xff] }
   0x2   :  { %v164_v3 = vpack.c.bf16 %v17_v1, %v16_v0  ;;  %v19_v4 = vld [vmem:[%s262_s1 + $0x18] sm:$0xff]  ;;  %v12_v5 = vld [vmem:[%s261_s0] sm:$0xff]  ;;  %v14_v6 = vld [vmem:[%s261_s0 + $0x10] sm:$0xff] }
   0x3   :  { %v168_v7 = vpack.c.bf16 %v19_v4, %v18_v2  ;;  %158 = vmatprep.mubr.msk.f32.mxu0 %vm20_vm0, %v12_v5  ;;  %161 = vmatprep.mubr.msk.f32.mxu1 %vm20_vm0, %v14_v6 }
   0x4   :  { %7 = vsyncpa [#allocation3], 0  ;;  %165 = vmatprep.subr.bf16.mxu0 %v164_v3  ;;  %172 = vmatprep.subr.bf16.mxu1 %v164_v3  ;;  %v13_v8 = vld [vmem:[%s261_s0 + $0x8] sm:$0xff]  ;;  %v15_v9 = vld [vmem:[%s261_s0 + $0x18] sm:$0xff]  ;;  %s203_s24 = smov [#allocation2]  }
   0x5   :  { %167 = vmatpush3.bf16.msra.mxu0 %v164_v3  ;;  %174 = vmatpush3.bf16.msra.mxu1 %v164_v3  ;;  %s127_s25 = sshll.u32 %s203_s24, 4  ;;  %s128_s25 = int_to_ptr.vmem [resolvable:$true] %s127_s25 }
   0x6   :  { %169 = vmatprep.subr.bf16.mxu0 %v168_v7  ;;  %173 = vmatprep.subr.bf16.mxu1 %v168_v7  ;;  %s179_s26 = scalar_lea.vmem %s128_s25, 512  ;;  %p184_p1 = scmp.lt.s32.totalorder %s128_s25, %s128_s25 }
   0x7   :  { %p180_p0 = scmp.ne.s32.totalorder %s128_s25, %s179_s26  ;;  %p185_p2 = scmp.lt.s32.totalorder %s179_s26, %s179_s26 }
   0x9   :  { %171 = vmatpush3.bf16.msra.mxu0 %v168_v7  ;;  %175 = vmatpush3.bf16.msra.mxu1 %v168_v7  ;;  %p186_p3 = por %p185_p2, %p184_p1 }
   0xb   :  { %p187_p4 = pnand %p186_p3, %p180_p0 }
   0xc   :  { %159 = vmatmul.mubr.msk.f32.vlgmr.msra.gmra.mrb[0].mxu0 %vm20_vm0, %v13_v8  ;;  %162 = vmatmul.mubr.msk.f32.vlgmr.msra.gmra.mrb[0].mxu1 %vm20_vm0, %v15_v9 }
  0xdf   :  { %v160_v10 = vpop.f32.mrb[0].mxu0  ;;  %v163_v11 = vpop.f32.mrb[0].mxu1 }
  0xe0   :  { %119 = vst [vmem:[#allocation2 + $0x8] sm:$0xff] %v160_v10  ;;  %121 = vst [vmem:[#allocation2 + $0x18] sm:$0xff] %v163_v11  ;;  %v99_v12 = vpop.f32.mrb[1].mxu0  ;;  %v109_v13 = vpop.f32.mrb[1].mxu1 }
  0xe1   :  { %118 = vst [vmem:[#allocation2] sm:$0xff] %v99_v12  ;;  %120 = vst [vmem:[#allocation2 + $0x10] sm:$0xff] %v109_v13 }
  0xe2   :  { %190 = shalt.err (!%p187_p4)
}
  0xe3   :  { %s191_s28 = scalar_lea.hbm %s263_s2, 512 }
  0xe4   :  { %p192_p5 = scmp.ne.s32.totalorder %s263_s2, %s191_s28  ;;  %p195_p6 = scmp.lt.u32.totalorder %s191_s28, %s263_s2 }
  0xe6   :  { %p197_p7 = pnand %p195_p6, %p192_p5 }
  0xe8   :  { %200 = shalt.err (!%p197_p7)
}
  0xe9   :  { %s204_s5 = smov 128   ;;  %s205_s6 = smov 8  }
  0xea   :  { %133 = dma.vmem_to_hbm [thread:$0]  %s128_s25, 512, %s263_s2, [#allocation3], %s204_s5, %s204_s5, %s205_s6  }
  0xeb   :  { %201 = dma.done.wait [#allocation3], 512  }
  0xec   :  { %202 = vsyncadd [#allocation3], 4294966784 }
  0xed   :  { %137 = vsyncpa [#allocation3], 1 }

</bundles_post_ra>
